<compile_context>
chip_gen: v6e
topology: v6e:2x2x1
jax: 0.10.0
libtpu: 0.0.40
codegen_flags: <defaults>
</compile_context>

<pallas_src>
import jax
import jax.numpy as jnp
from jax.experimental import pallas as pl
from jax.experimental.pallas import tpu as pltpu


def _round_up(x, m):
    return ((x + m - 1) // m) * m


# --------------------------------------------------------------------------
# Kernel
# --------------------------------------------------------------------------
def classify_branch_kernel(x_ref, w1_ref, b1_ref, w2_ref, b2_ref, o_ref):
    """Fused lin1 -> lin2 -> softmax(last axis) for one (TB, *) batch tile.

    x/w1/w2 arrive pre-cast to bf16 (MXU operands, f32 accumulation); biases
    are f32.  Padded class lanes of b2 are pre-filled with -1e30, so they drop
    out of the softmax without any in-kernel masking.
    """
    # lin1: (TB, C_pad) @ (C_pad, H_pad)
    h = jnp.dot(x_ref[...], w1_ref[...],
                preferred_element_type=jnp.float32) + b1_ref[...]
    # lin2: (TB, H_pad) @ (H_pad, N_pad)
    logits = jnp.dot(h.astype(jnp.bfloat16), w2_ref[...],
                     preferred_element_type=jnp.float32) + b2_ref[...]
    # Numerically-stable softmax over the class (last) dimension.
    m = jnp.max(logits, axis=-1, keepdims=True)
    e = jnp.exp(logits - m)
    denom = jnp.sum(e, axis=-1, keepdims=True)
    o_ref[...] = (e * pl.reciprocal(denom, approx=True)).astype(o_ref.dtype)


# --------------------------------------------------------------------------
# Parameter packing (hoisted out of the per-call path)
# --------------------------------------------------------------------------
def pack_classify_params(w1, b1, w2, b2):
    """Pad to 128-lane multiples and pre-cast weights to bf16, once.

    w1: (in, hidden), b1: (1, hidden) or (hidden,)
    w2: (hidden, classes), b2: (1, classes) or (classes,)
    """
    C_in, H = w1.shape
    num_classes = w2.shape[1]
    C_pad = _round_up(C_in, 128)
    H_pad = _round_up(H, 128)
    N_pad = _round_up(num_classes, 128)

    b1 = jnp.reshape(b1, (1, H)).astype(jnp.float32)
    b2 = jnp.reshape(b2, (1, num_classes)).astype(jnp.float32)

    w1_p = jnp.pad(w1.astype(jnp.bfloat16), ((0, C_pad - C_in), (0, H_pad - H)))
    b1_p = jnp.pad(b1, ((0, 0), (0, H_pad - H)))
    w2_p = jnp.pad(w2.astype(jnp.bfloat16),
                   ((0, H_pad - H), (0, N_pad - num_classes)))
    # Padded class lanes: W2 columns are zero, bias -1e30 => exp underflows to 0.
    b2_p = jnp.pad(b2, ((0, 0), (0, N_pad - num_classes)),
                   constant_values=-1e30)

    return {"w1": w1_p, "b1": b1_p, "w2": w2_p, "b2": b2_p,
            "in_channels": C_in, "hidden": H, "num_classes": num_classes}


# --------------------------------------------------------------------------
# VMEM budgeting (generation aware)
# --------------------------------------------------------------------------
def _vmem_budget_bytes():
    """~3/4 of physical VMEM: 64 MiB on v7x, 128 MiB on v5e/v6e."""
    try:
        phys = pltpu.get_tpu_info().vmem_capacity_bytes
    except Exception:
        phys = 64 * 1024 * 1024
    return int(phys) * 3 // 4


def _vmem_estimate_bytes(TB, C_pad, H_pad, N_pad):
    b = 0
    b += 2 * TB * C_pad * 2            # x tile, bf16, double-buffered
    b += 2 * TB * N_pad * 4            # out tile, f32, double-buffered
    b += C_pad * H_pad * 2             # w1 bf16 (single-buffered, resident)
    b += H_pad * N_pad * 2             # w2 bf16 (single-buffered, resident)
    b += (H_pad + N_pad) * 4           # biases f32
    b += TB * H_pad * (4 + 2)          # f32 h + transient bf16 copy of h
    b += 2 * TB * N_pad * 4            # f32 logits / exp temporaries
    return b


# --------------------------------------------------------------------------
# Wrapper
# --------------------------------------------------------------------------
def classify_branch(x, params, *, max_batch_tile=2048, force_pallas=False):
    """x: (B, in_channels) f32; params: output of pack_classify_params.
    Returns softmax probabilities (B, num_classes) f32."""
    B, C_in = x.shape
    assert C_in == params["in_channels"], "in_channels mismatch"
    H = params["hidden"]
    num_classes = params["num_classes"]
    w1_p, b1_p, w2_p, b2_p = params["w1"], params["b1"], params["w2"], params["b2"]
    C_pad, H_pad = w1_p.shape
    N_pad = w2_p.shape[1]

    # Tiny-shape fast path: a single-tile pallas_call is pure launch overhead.
    if not force_pallas and B <= 8:
        h = jnp.dot(x.astype(jnp.bfloat16), w1_p[:C_in, :H],
                    preferred_element_type=jnp.float32) + b1_p[:, :H]
        logits = jnp.dot(h.astype(jnp.bfloat16), w2_p[:H, :num_classes],
                         preferred_element_type=jnp.float32) + b2_p[:, :num_classes]
        return jax.nn.softmax(logits, axis=-1)

    # Size the batch tile from the VMEM budget (bigger tiles on v5e/v6e's
    # 128 MiB than on v7x's 64 MiB); keep it 8-aligned.
    budget = _vmem_budget_bytes()
    TB = min(max_batch_tile, _round_up(B, 8))
    while TB > 8 and _vmem_estimate_bytes(TB, C_pad, H_pad, N_pad) > budget:
        TB = max(8, _round_up(TB // 2, 8))
    # TODO(synk): if resident w1 (C_pad*H_pad in bf16) alone blows the budget
    #             (huge SPP vectors on v7x), add a K grid axis over C_pad with
    #             a VMEM f32 accumulator instead of shrinking TB further.

    B_pad = _round_up(B, TB)

    # Skip the pad (an extra HBM read+write of x) when already aligned.
    x_bf = x.astype(jnp.bfloat16)
    if B_pad != B or C_pad != C_in:
        x_bf = jnp.pad(x_bf, ((0, B_pad - B), (0, C_pad - C_in)))

    grid = (B_pad // TB,)
    est = _vmem_estimate_bytes(TB, C_pad, H_pad, N_pad)
    vmem_limit = int(min(max(est * 5 // 4, 16 * 1024 * 1024), budget))

    resident = pl.Buffered(1)  # constant-index blocks: single buffer, VMEM-resident

    out_p = pl.pallas_call(
        classify_branch_kernel,
        out_shape=jax.ShapeDtypeStruct((B_pad, N_pad), jnp.float32),
        grid_spec=pltpu.PrefetchScalarGridSpec(
            num_scalar_prefetch=0,
            grid=grid,
            in_specs=[
                pl.BlockSpec((TB, C_pad), lambda i: (i, 0)),        # x (pipelined)
                pl.BlockSpec((C_pad, H_pad), lambda i: (0, 0),
                             pipeline_mode=resident),               # w1
                pl.BlockSpec((1, H_pad), lambda i: (0, 0),
                             pipeline_mode=resident),               # b1
                pl.BlockSpec((H_pad, N_pad), lambda i: (0, 0),
                             pipeline_mode=resident),               # w2
                pl.BlockSpec((1, N_pad), lambda i: (0, 0),
                             pipeline_mode=resident),               # b2
            ],
            out_specs=pl.BlockSpec((TB, N_pad), lambda i: (i, 0)),
        ),
        compiler_params=pltpu.CompilerParams(
            dimension_semantics=("parallel",),
            vmem_limit_bytes=vmem_limit,
        ),
    )(x_bf, w1_p, b1_p, w2_p, b2_p)

    return out_p[:B, :num_classes]


# --------------------------------------------------------------------------
# Test
# --------------------------------------------------------------------------
def init_linear_params(key, fan_in, fan_out):
    """Deterministic init mimicking nn.Linear defaults (uniform ±1/sqrt(fan_in))."""
    kw, kb = jax.random.split(key)
    bound = 1.0 / jnp.sqrt(jnp.float32(fan_in))
    # stored as (in, out) so the kernel does x @ W
    w = jax.random.uniform(kw, (fan_in, fan_out), jnp.float32, -bound, bound)
    b = jax.random.uniform(kb, (1, fan_out), jnp.float32, -bound, bound)
    return w, b


if __name__ == "__main__":
    # Small shapes consistent with the module: SPP vector -> hidden -> classes.
    B = 2
    in_channels = 32
    hidden_cls = 16
    num_classes = 8

    key = jax.random.PRNGKey(0)
    kx, k1, k2 = jax.random.split(key, 3)

    x = jax.random.normal(kx, (B, in_channels), jnp.float32)
    w1, b1 = init_linear_params(k1, in_channels, hidden_cls)
    w2, b2 = init_linear_params(k2, hidden_cls, num_classes)

    # Pack once (padding + bf16 cast hoisted out of the per-call path).
    params = pack_classify_params(w1, b1, w2, b2)

    # Force the Pallas path so the kernel is exercised even at tiny shapes.
    out = jax.block_until_ready(classify_branch(x, params, force_pallas=True))

    # Reference with matching bf16 matmul operands (f32 accumulate / softmax).
    h_ref = jnp.dot(x.astype(jnp.bfloat16), w1.astype(jnp.bfloat16),
                    preferred_element_type=jnp.float32) + b1
    logits_ref = jnp.dot(h_ref.astype(jnp.bfloat16), w2.astype(jnp.bfloat16),
                         preferred_element_type=jnp.float32) + b2
    ref = jax.nn.softmax(logits_ref, axis=-1)

    assert out.shape == (B, num_classes)
    assert jnp.allclose(out, ref, atol=2e-3, rtol=2e-3), \
        float(jnp.max(jnp.abs(out - ref)))
    # approx reciprocal => rows sum to 1 only to ~1e-3
    assert jnp.allclose(jnp.sum(out, axis=-1), 1.0, atol=2e-3)

    # Also sanity-check the tiny-shape fast path agrees.
    out_fast = jax.block_until_ready(classify_branch(x, params))
    assert jnp.allclose(out_fast, ref, atol=2e-3, rtol=2e-3)

    print("KERNEL_OK")
</pallas_src>

<mosaic_0001>
module attributes {stable_mosaic.version = 11 : i64} {
  func.func @classify_branch_kernel(%arg0: i32, %arg1: memref<8x128xbf16, #tpu.memory_space<vmem>>, %arg2: memref<128x128xbf16, #tpu.memory_space<vmem>>, %arg3: memref<1x128xf32, #tpu.memory_space<vmem>>, %arg4: memref<128x128xbf16, #tpu.memory_space<vmem>>, %arg5: memref<1x128xf32, #tpu.memory_space<vmem>>, %arg6: memref<8x128xf32, #tpu.memory_space<vmem>>) attributes {dimension_semantics = [#tpu.dimension_semantics<parallel>], iteration_bounds = array<i64: 1>, scalar_prefetch = 0 : i64, scratch_operands = 0 : i64, tpu.core_type = #tpu.core_type<tc>, window_params = [{transform_indices = @transform_0, window_bounds = array<i64: 8, 128>}, {pipeline_mode = #tpu.pipeline_mode<synchronous>, transform_indices = @transform_1, window_bounds = array<i64: 128, 128>}, {pipeline_mode = #tpu.pipeline_mode<synchronous>, transform_indices = @transform_2, window_bounds = array<i64: 1, 128>}, {pipeline_mode = #tpu.pipeline_mode<synchronous>, transform_indices = @transform_3, window_bounds = array<i64: 128, 128>}, {pipeline_mode = #tpu.pipeline_mode<synchronous>, transform_indices = @transform_4, window_bounds = array<i64: 1, 128>}, {transform_indices = @transform_5, window_bounds = array<i64: 8, 128>}]} {
    %c0 = arith.constant 0 : index
    %c0_0 = arith.constant 0 : index
    %0 = vector.load %arg1[%c0, %c0_0] : memref<8x128xbf16, #tpu.memory_space<vmem>>, vector<8x128xbf16>
    %c0_1 = arith.constant 0 : index
    %c0_2 = arith.constant 0 : index
    %1 = vector.load %arg2[%c0_1, %c0_2] : memref<128x128xbf16, #tpu.memory_space<vmem>>, vector<128x128xbf16>
    %cst = arith.constant dense<0.000000e+00> : vector<8x128xf32>
    %2 = tpu.matmul %0, %1, %cst {dimension_numbers = #tpu.dot_dimension_numbers<[1], [0], [0], [1], [0, 0, 1, 1], [], []>} : vector<8x128xbf16>, vector<128x128xbf16>, vector<8x128xf32> -> vector<8x128xf32>
    %c0_3 = arith.constant 0 : index
    %c0_4 = arith.constant 0 : index
    %3 = vector.load %arg3[%c0_3, %c0_4] : memref<1x128xf32, #tpu.memory_space<vmem>>, vector<1x128xf32>
    %4 = vector.broadcast %3 : vector<1x128xf32> to vector<8x128xf32>
    %5 = arith.addf %2, %4 : vector<8x128xf32>
    %6 = arith.truncf %5 : vector<8x128xf32> to vector<8x128xbf16>
    %c0_5 = arith.constant 0 : index
    %c0_6 = arith.constant 0 : index
    %7 = vector.load %arg4[%c0_5, %c0_6] : memref<128x128xbf16, #tpu.memory_space<vmem>>, vector<128x128xbf16>
    %cst_7 = arith.constant dense<0.000000e+00> : vector<8x128xf32>
    %8 = tpu.matmul %6, %7, %cst_7 {dimension_numbers = #tpu.dot_dimension_numbers<[1], [0], [0], [1], [0, 0, 1, 1], [], []>} : vector<8x128xbf16>, vector<128x128xbf16>, vector<8x128xf32> -> vector<8x128xf32>
    %c0_8 = arith.constant 0 : index
    %c0_9 = arith.constant 0 : index
    %9 = vector.load %arg5[%c0_8, %c0_9] : memref<1x128xf32, #tpu.memory_space<vmem>>, vector<1x128xf32>
    %10 = vector.broadcast %9 : vector<1x128xf32> to vector<8x128xf32>
    %11 = arith.addf %8, %10 : vector<8x128xf32>
    %cst_10 = arith.constant dense<0xFF800000> : vector<8xf32>
    %12 = vector.multi_reduction <maximumf>, %11, %cst_10 [1] : vector<8x128xf32> to vector<8xf32>
    %13 = vector.shape_cast %12 : vector<8xf32> to vector<8x1xf32>
    %14 = vector.broadcast %13 : vector<8x1xf32> to vector<8x128xf32>
    %15 = arith.subf %11, %14 : vector<8x128xf32>
    %16 = math.exp %15 : vector<8x128xf32>
    %cst_11 = arith.constant dense<0.000000e+00> : vector<8xf32>
    %17 = vector.multi_reduction <add>, %16, %cst_11 [1] : vector<8x128xf32> to vector<8xf32>
    %18 = vector.shape_cast %17 : vector<8xf32> to vector<8x1xf32>
    %19 = tpu.reciprocal %18 {approx = true} : vector<8x1xf32> -> vector<8x1xf32>
    %20 = vector.broadcast %19 : vector<8x1xf32> to vector<8x128xf32>
    %21 = arith.mulf %16, %20 : vector<8x128xf32>
    %c0_12 = arith.constant 0 : index
    %c0_13 = arith.constant 0 : index
    %22 = vector.load %arg6[%c0_12, %c0_13] : memref<8x128xf32, #tpu.memory_space<vmem>>, vector<8x128xf32>
    tpu.vector_store %arg6[%c0_12, %c0_13], %21 {strides = array<i32>} : memref<8x128xf32, #tpu.memory_space<vmem>>, vector<8x128xf32>,
    return
  }
  func.func @transform_0(%arg0: i32) -> (i32, i32) {
    %c0_i32 = arith.constant 0 : i32
    %c0_i32_0 = arith.constant 0 : i32
    return %arg0, %c0_i32 : i32, i32
  }
  func.func @transform_1(%arg0: i32) -> (i32, i32) {
    %c0_i32 = arith.constant 0 : i32
    %c0_i32_0 = arith.constant 0 : i32
    %c0_i32_1 = arith.constant 0 : i32
    return %c0_i32, %c0_i32_0 : i32, i32
  }
  func.func @transform_2(%arg0: i32) -> (i32, i32) {
    %c0_i32 = arith.constant 0 : i32
    %c0_i32_0 = arith.constant 0 : i32
    %c0_i32_1 = arith.constant 0 : i32
    return %c0_i32, %c0_i32_0 : i32, i32
  }
  func.func @transform_3(%arg0: i32) -> (i32, i32) {
    %c0_i32 = arith.constant 0 : i32
    %c0_i32_0 = arith.constant 0 : i32
    %c0_i32_1 = arith.constant 0 : i32
    return %c0_i32, %c0_i32_0 : i32, i32
  }
  func.func @transform_4(%arg0: i32) -> (i32, i32) {
    %c0_i32 = arith.constant 0 : i32
    %c0_i32_0 = arith.constant 0 : i32
    %c0_i32_1 = arith.constant 0 : i32
    return %c0_i32, %c0_i32_0 : i32, i32
  }
  func.func @transform_5(%arg0: i32) -> (i32, i32) {
    %c0_i32 = arith.constant 0 : i32
    %c0_i32_0 = arith.constant 0 : i32
    return %arg0, %c0_i32 : i32, i32
  }
}

</mosaic_0001>

<bundles_post_ra>
// kernel: tpu_custom_call.1
= control target key start
LH: loop header
LB: loop body
LE: loop exit
PB: predicated region body
PF: predicated region fallthrough
CT: control target
= control target key end

     0   :  { %10 = vsyncpa [#allocation3], 0  ;;  %s557_s0 = inlined_call_operand.hbm [shape: bf16[8,128], index: 0, kind: input, shape index: {}]   ;;  %s558_s1 = inlined_call_operand.hbm [shape: bf16[128,128], index: 1, kind: input, shape index: {}]   ;;  %s559_s2 = inlined_call_operand.vmem [shape: f32[1,128], index: 2, kind: input, shape index: {}]   ;;  %s560_s3 = inlined_call_operand.hbm [shape: bf16[128,128], index: 3, kind: input, shape index: {}]   ;;  %s561_s4 = inlined_call_operand.vmem [shape: f32[1,128], index: 4, kind: input, shape index: {}]   ;;  %s562_s5 = inlined_call_operand.hbm [shape: f32[8,128], index: 5, kind: output, shape index: {}]  }
   0x1   :  { %11 = vsyncpa [#allocation6], 0 }
   0x2   :  { %12 = vsyncpa [#allocation4], 0  ;;  %s501_s18 = smov [#allocation5]  }
   0x3   :  { %s28_s19 = sshll.u32 %s501_s18, 4  ;;  %s29_s19 = int_to_ptr.vmem [resolvable:$true] %s28_s19 }
   0x4   :  { %s423_s20 = scalar_lea.vmem %s29_s19, 1024  ;;  %p428_p1 = scmp.lt.s32.totalorder %s29_s19, %s29_s19 }
   0x5   :  { %p424_p0 = scmp.ne.s32.totalorder %s29_s19, %s423_s20  ;;  %p429_p2 = scmp.lt.s32.totalorder %s423_s20, %s423_s20 }
   0x7   :  { %p430_p3 = por %p429_p2, %p428_p1 }
   0x9   :  { %p431_p4 = pnand %p430_p3, %p424_p0 }
   0xb   :  { %434 = shalt.err (!%p431_p4)
}
   0xc   :  { %s502_s21 = smov 64   ;;  %s503_s22 = smov 4  }
   0xd   :  { %34 = dma.hbm_to_vmem [thread:$0]  %s558_s1, 1024, %s29_s19, [#allocation6], %s502_s21, %s502_s21, %s503_s22  }
   0xe   :  { %s504_s25 = smov [#allocation2]   ;;  %s505_s27 = smov [#allocation7]  }
   0xf   :  { %s19_s26 = sshll.u32 %s504_s25, 4  ;;  %s42_s28 = sshll.u32 %s505_s27, 4  ;;  %s20_s26 = int_to_ptr.vmem [resolvable:$true] %s19_s26  ;;  %s43_s28 = int_to_ptr.vmem [resolvable:$true] %s42_s28 }
  0x10   :  { %s443_s29 = scalar_lea.vmem %s20_s26, 64  ;;  %p448_p6 = scmp.lt.s32.totalorder %s20_s26, %s20_s26 }
  0x11   :  { %p444_p5 = scmp.ne.s32.totalorder %s20_s26, %s443_s29  ;;  %p449_p7 = scmp.lt.s32.totalorder %s443_s29, %s443_s29 }
  0x13   :  { %p450_p8 = por %p449_p7, %p448_p6 }
  0x15   :  { %p451_p9 = pnand %p450_p8, %p444_p5 }
  0x17   :  { %454 = shalt.err (!%p451_p9)
}
  0x18   :  { %22 = dma.hbm_to_vmem [thread:$0]  %s557_s0, 64, %s20_s26, [#allocation3]  }
  0x19   :  { %s463_s7 = scalar_lea.vmem %s43_s28, 1024  ;;  %p468_p11 = scmp.lt.s32.totalorder %s43_s28, %s43_s28 }
  0x1a   :  { %p464_p10 = scmp.ne.s32.totalorder %s43_s28, %s463_s7  ;;  %p469_p12 = scmp.lt.s32.totalorder %s463_s7, %s463_s7 }
  0x1c   :  { %p470_p13 = por %p469_p12, %p468_p11 }
  0x1e   :  { %p471_p0 = pnand %p470_p13, %p464_p10 }
  0x20   :  { %474 = shalt.err (!%p471_p0)
}
  0x21   :  { %48 = dma.hbm_to_vmem [thread:$0]  %s560_s3, 1024, %s43_s28, [#allocation6], %s502_s21, %s502_s21, %s503_s22  }
  0x22   :  { %495 = dma.done.wait [#allocation3], 64  }
  0x23   :  { %496 = vsyncadd [#allocation3], 4294967232 }
  0x24   :  { %497 = dma.done.wait [#allocation6], 2048  }
  0x25   :  { %498 = vsyncadd [#allocation6], 4294965248  ;;  %v506_v0 = vmov 0.0   ;;  %vm507_vm0 = vmmov 0   ;;  %v395_v1 = vld [vmem:[#allocation5 + $0x38] sm:$0xff]   ;;  %v396_v2 = vld [vmem:[#allocation5 + $0x30] sm:$0xff]  }
  0x26   :  { %347 = vmatprep.subr.bf16.mxu0 %v506_v0  ;;  %363 = vmatprep.mubr.msk.bf16.mxu0 %vm507_vm0, %v506_v0  ;;  %v397_v3 = vld [vmem:[#allocation5 + $0x28] sm:$0xff]   ;;  %v403_v4 = vld [vmem:[#allocation7 + $0x38] sm:$0xff]   ;;  %v398_v5 = vld [vmem:[#allocation5 + $0x20] sm:$0xff]  }
  0x27   :  { %367 = vmatprep.subr.bf16.mxu1 %v506_v0  ;;  %383 = vmatprep.mubr.msk.bf16.mxu1 %vm507_vm0, %v506_v0  ;;  %v404_v6 = vld [vmem:[#allocation7 + $0x30] sm:$0xff]   ;;  %v399_v7 = vld [vmem:[#allocation5 + $0x18] sm:$0xff]   ;;  %v405_v8 = vld [vmem:[#allocation7 + $0x28] sm:$0xff]  }
  0x28   :  { %348 = vmatpush3.bf16.msra.mxu0 %v395_v1  ;;  %368 = vmatpush3.bf16.msra.mxu1 %v403_v4  ;;  %v400_v9 = vld [vmem:[#allocation5 + $0x10] sm:$0xff]   ;;  %v406_v10 = vld [vmem:[#allocation7 + $0x20] sm:$0xff]   ;;  %v401_v11 = vld [vmem:[#allocation5 + $0x8] sm:$0xff]  }
  0x29   :  { %349 = vmatprep.subr.bf16.mxu0 %v506_v0  ;;  %369 = vmatprep.subr.bf16.mxu1 %v506_v0  ;;  %v407_v12 = vld [vmem:[#allocation7 + $0x18] sm:$0xff]   ;;  %v402_v13 = vld [vmem:[#allocation5] sm:$0xff]   ;;  %v408_v14 = vld [vmem:[#allocation7 + $0x10] sm:$0xff]  }
  0x2a   :  { %v61_v15 = vld [vmem:[#allocation2] sm:$0xf]  ;;  %v409_v16 = vld [vmem:[#allocation7 + $0x8] sm:$0xff]   ;;  %v410_v17 = vld [vmem:[#allocation7] sm:$0xff]  }
  0x2b   :  { %v311_v18 = vld [vmem:[%s559_s2] ss:$0 sm:$0xff]  ;;  %s508_s2 = smov [#allocation8]  }
  0x2c   :  { %350 = vmatpush3.bf16.msra.mxu0 %v396_v2  ;;  %370 = vmatpush3.bf16.msra.mxu1 %v404_v6  ;;  %v320_v25 = vld [vmem:[%s561_s4] ss:$0 sm:$0xff]  ;;  %s301_s11 = sshll.u32 %s508_s2, 4  ;;  %s302_s11 = int_to_ptr.vmem [resolvable:$true] %s301_s11 }
  0x2d   :  { %351 = vmatprep.subr.bf16.mxu0 %v506_v0  ;;  %371 = vmatprep.subr.bf16.mxu1 %v506_v0  ;;  %s475_s4 = scalar_lea.vmem %s302_s11, 128  ;;  %p480_p2 = scmp.lt.s32.totalorder %s302_s11, %s302_s11 }
  0x2e   :  { %p476_p1 = scmp.ne.s32.totalorder %s302_s11, %s475_s4  ;;  %p481_p3 = scmp.lt.s32.totalorder %s475_s4, %s475_s4 }
  0x30   :  { %352 = vmatpush3.bf16.msra.mxu0 %v397_v3  ;;  %372 = vmatpush3.bf16.msra.mxu1 %v405_v8  ;;  %p482_p4 = por %p481_p3, %p480_p2 }
  0x31   :  { %353 = vmatprep.subr.bf16.mxu0 %v506_v0  ;;  %373 = vmatprep.subr.bf16.mxu1 %v506_v0 }
  0x32   :  { %p483_p5 = pnand %p482_p4, %p476_p1 }
  0x34   :  { %354 = vmatpush3.bf16.msra.mxu0 %v398_v5  ;;  %374 = vmatpush3.bf16.msra.mxu1 %v406_v10 }
  0x35   :  { %355 = vmatprep.subr.bf16.mxu0 %v506_v0  ;;  %375 = vmatprep.subr.bf16.mxu1 %v506_v0 }
  0x38   :  { %356 = vmatpush3.bf16.msra.mxu0 %v399_v7  ;;  %376 = vmatpush3.bf16.msra.mxu1 %v407_v12 }
  0x39   :  { %357 = vmatprep.subr.bf16.mxu0 %v506_v0  ;;  %377 = vmatprep.subr.bf16.mxu1 %v506_v0 }
  0x3c   :  { %358 = vmatpush3.bf16.msra.mxu0 %v400_v9  ;;  %378 = vmatpush3.bf16.msra.mxu1 %v408_v14 }
  0x3d   :  { %359 = vmatprep.subr.bf16.mxu0 %v506_v0  ;;  %379 = vmatprep.subr.bf16.mxu1 %v506_v0 }
  0x40   :  { %360 = vmatpush3.bf16.msra.mxu0 %v401_v11  ;;  %380 = vmatpush3.bf16.msra.mxu1 %v409_v16 }
  0x41   :  { %361 = vmatprep.subr.bf16.mxu0 %v506_v0  ;;  %381 = vmatprep.subr.bf16.mxu1 %v506_v0 }
  0x44   :  { %362 = vmatpush3.bf16.msra.mxu0 %v402_v13  ;;  %382 = vmatpush3.bf16.msra.mxu1 %v410_v17 }
  0x47   :  { %364 = vmatmul.mubr.bf16.vlgmr.msra.gmra.mxu0 %v61_v15 }
 0x107   :  { %v167_v19 = vpop.f32.mrf.mxu0 }
 0x108   :  { %v168_v20 = vadd.f32 %v311_v18, %v167_v19 }
 0x109   :  { %v365_v21 = vpop.f32.mrf.mxu0 }
 0x10a   :  { %v173_v22 = vpack.c.bf16 %v168_v20, %v168_v20 }
 0x10b   :  { %v170_v23 = vpop.f32.mrf.mxu0 }
 0x10c   :  { %384 = vmatmul.mubr.bf16.vlgmr.msra.gmra.mxu1 %v173_v22 }
 0x10d   :  { %v366_v24 = vpop.f32.mrf.mxu0 }
 0x1cc   :  { %v279_v26 = vpop.f32.mrf.mxu1 }
 0x1cd   :  { %v280_v27 = vadd.f32 %v320_v25, %v279_v26 }
 0x1ce   :  { %v385_v28 = vpop.f32.mrf.mxu1 }
 0x1cf   :  { %285 = vmax.xlane.f32.xlu0 %v280_v27 }
 0x1d0   :  { %v282_v29 = vpop.f32.mrf.mxu1 }
 0x1d2   :  { %v386_v30 = vpop.f32.mrf.mxu1 }
 0x258   :  { %v286_v31 = vpop.xlane.xlu0 %285 }
 0x259   :  { %v287_v32 = vsub.f32 %v280_v27, %v286_v31 }
 0x25b   :  { %v288_v33 = vmul.f32 1.442695, %v287_v32 }
 0x25d   :  { %411 = vpow2.f32 %v288_v33 }
 0x26a   :  { %v412_v34 = vpop.eup %411 }
 0x26b   :  { %290 = vadd.xlane.f32.xlu0 %v412_v34 }
 0x2f4   :  { %v291_v35 = vpop.xlane.xlu0 %290 }
 0x2f5   :  { %413 = vrcp.f32 %v291_v35 }
 0x302   :  { %v414_v36 = vpop.eup %413 }
 0x303   :  { %v293_v37 = vmul.f32 %v414_v36, %v412_v34 }
 0x305   :  { %294 = vst [vmem:[#allocation8] sm:$0xff] %v293_v37 }
 0x306   :  { %486 = shalt.err (!%p483_p5)
}
 0x307   :  { %304 = dma.vmem_to_hbm [thread:$0]  %s302_s11, 128, %s562_s5, [#allocation4]  }
 0x308   :  { %499 = dma.done.wait [#allocation4], 128  }
 0x309   :  { %500 = vsyncadd [#allocation4], 4294967168 }
 0x30a   :  { %308 = vsyncpa [#allocation3], 1 }
 0x30b   :  { %309 = vsyncpa [#allocation6], 1 }
 0x30c   :  { %310 = vsyncpa [#allocation4], 1 }

</bundles_post_ra>
